<compile_context>
chip_gen: v7x
topology: tpu7x:2x2x1
jax: 0.10.0
libtpu: 0.0.40
codegen_flags: <defaults>
</compile_context>

<pallas_src>
import functools

import jax
import jax.numpy as jnp
from jax.experimental import pallas as pl
from jax.experimental.pallas import tpu as pltpu


def _cdiv(a, b):
    return -(-a // b)


def _round_up(x, m):
    return ((x + m - 1) // m) * m


def _apply_nonlinearity(h, nonlinearity):
    # Mirrors Decoder.apply_nonlinearity: anything not in the list is a no-op
    # (including the default `nonlinearity=False`).
    if nonlinearity == "relu":
        return jnp.maximum(h, 0.0)
    elif nonlinearity == "tanh":
        return jnp.tanh(h)
    elif nonlinearity == "softplus":
        # Numerically stable: max(h,0) + log1p(exp(-|h|))
        return jnp.maximum(h, 0.0) + jnp.log1p(jnp.exp(-jnp.abs(h)))
    elif nonlinearity == "sigmoid":
        return jax.nn.sigmoid(h)
    return h


def _decoder_kernel(w0b0_ref, zt_ref, pcol_ref, x_ref, lv_ref, *,
                    latent_dim, data_dim, nonlinearity):
    """One batch tile of the fused decoder forward (lane-dense layout).

    w0b0_ref : SMEM [latent_dim + 1, 2]   rows 0..L-1 = W0 (in x out), row L = b0
    zt_ref   : VMEM [latent_dim, tb]      z transposed (batch on lanes)
    pcol_ref : VMEM [2*data_dim, 3]       col 0 = [Wx|Wl][0,:], col 1 = [Wx|Wl][1,:],
                                          col 2 = [bx|bl]
    x_ref    : VMEM [data_dim, tb]        x^T
    lv_ref   : VMEM [data_dim, tb]        logvarx^T
    """
    z = zt_ref[...]                                           # [L, tb]

    # --- layers[0]: Linear(latent_dim -> 2) + nonlinearity --------------------
    # Scalar weights from SMEM broadcast for free into the VPU FMAs.
    hs = []
    for k in range(2):                                        # 2 hidden units
        hk = z[0:1, :] * w0b0_ref[0, k]
        for j in range(1, latent_dim):                        # unrolled K
            hk = hk + z[j:j + 1, :] * w0b0_ref[j, k]
        hk = hk + w0b0_ref[latent_dim, k]                     # + b0[k]
        hs.append(_apply_nonlinearity(hk, nonlinearity))      # [1, tb]

    # --- fused layers[1] & [2]: Linear(2 -> 2*data_dim), lane-dense on VPU ----
    w0c = pcol_ref[:, 0:1]                                    # [2D, 1]
    w1c = pcol_ref[:, 1:2]                                    # [2D, 1]
    bc = pcol_ref[:, 2:3]                                     # [2D, 1]
    out = bc + w0c * hs[0] + w1c * hs[1]                      # [2D, tb], dense
    x_ref[...] = out[:data_dim, :]                            # x^T
    lv_ref[...] = out[data_dim:, :]                           # logvarx^T


def pack_decoder_params(params):
    """Pack parameters ONCE per parameter set (outside the per-call hot path).

    params: w0 [L,2], b0 [1,2], wx [2,D], bx [1,D], wl [2,D], bl [1,D]
            (weights already stored as [in, out]).
    """
    w0b0 = jnp.concatenate([params["w0"], params["b0"]], axis=0)          # [L+1, 2]
    w_fused = jnp.concatenate([params["wx"], params["wl"]], axis=1)       # [2, 2D]
    b_fused = jnp.concatenate([params["bx"], params["bl"]], axis=1)       # [1, 2D]
    pcols = jnp.concatenate([w_fused, b_fused], axis=0).T                 # [2D, 3]
    return {"w0b0": w0b0.astype(jnp.float32), "pcols": pcols.astype(jnp.float32)}


def decoder_forward_t(z, packed, *, nonlinearity="relu", batch_tile=4096):
    """Hot path: fused decoder forward, lane-dense outputs.

    z      : [batch, latent_dim] float32 (module layout; the internal transpose
             of z is negligible: 16 B/elem vs 128 B/elem of output).
    packed : dict from pack_decoder_params().
    returns (x_t, logvarx_t), each [data_dim, batch] float32 (batch on lanes).
    """
    batch, latent_dim = z.shape
    w0b0 = packed["w0b0"]
    pcols = packed["pcols"]
    data_dim = pcols.shape[0] // 2

    # Balanced, lane-aligned batch tiles.  Keep >= 2 grid steps once the batch
    # is big enough so v7x's two TensorCores both get work (the "parallel"
    # grid axis shards across them); v5e/v6e just see two cheap steps.
    n_tiles = max(1, _cdiv(batch, batch_tile))
    if batch >= 256:
        n_tiles = max(n_tiles, 2)
    tb = _round_up(_cdiv(batch, n_tiles), 128)
    b_pad = tb * n_tiles

    zt = z.T.astype(jnp.float32)                              # [L, batch]
    if b_pad != batch:
        # Ragged tail only: padded columns compute garbage that is sliced off.
        zt = jnp.zeros((latent_dim, b_pad), jnp.float32).at[:, :batch].set(zt)

    kernel = functools.partial(
        _decoder_kernel,
        latent_dim=latent_dim,
        data_dim=data_dim,
        nonlinearity=nonlinearity,
    )

    out_block = pl.BlockSpec((data_dim, tb), lambda i: (0, i))
    x_t, lv_t = pl.pallas_call(
        kernel,
        out_shape=(jax.ShapeDtypeStruct((data_dim, b_pad), jnp.float32),
                   jax.ShapeDtypeStruct((data_dim, b_pad), jnp.float32)),
        grid=(n_tiles,),
        in_specs=[
            # tiny scalar table (W0, b0) -> SMEM, read as scalars in the kernel
            pl.BlockSpec(memory_space=pltpu.MemorySpace.SMEM),
            # z^T: tiled over batch (lanes), double-buffered by Pallas
            pl.BlockSpec((latent_dim, tb), lambda i: (0, i)),
            # fused second-layer weight/bias columns: resident in VMEM
            pl.BlockSpec(pcols.shape, lambda i: (0, 0)),
        ],
        out_specs=(out_block, out_block),
        compiler_params=pltpu.CompilerParams(
            dimension_semantics=("parallel",),
        ),
    )(w0b0, zt, pcols)

    if b_pad != batch:
        x_t = x_t[:, :batch]
        lv_t = lv_t[:, :batch]
    return x_t, lv_t


def decoder_forward(z, packed, *, nonlinearity="relu", batch_tile=4096):
    """Module-layout wrapper: returns (x, logvarx) as [batch, data_dim],
    matching Decoder.forward.  Perf-sensitive consumers should call
    decoder_forward_t directly to skip the final re-layout transposes."""
    x_t, lv_t = decoder_forward_t(z, packed, nonlinearity=nonlinearity,
                                  batch_tile=batch_tile)
    return x_t.T, lv_t.T


def init_decoder_params(key, latent_dim, data_dim):
    """Deterministic init mimicking nn.Linear default (uniform +-1/sqrt(fan_in)).

    Weights are stored pre-transposed as [in_features, out_features].
    """
    ks = jax.random.split(key, 6)

    def lin(kw, kb, fan_in, fan_out):
        bound = 1.0 / jnp.sqrt(jnp.float32(fan_in))
        w = jax.random.uniform(kw, (fan_in, fan_out), jnp.float32, -bound, bound)
        b = jax.random.uniform(kb, (1, fan_out), jnp.float32, -bound, bound)
        return w, b

    w0, b0 = lin(ks[0], ks[1], latent_dim, 2)        # layers[0]
    wx, bx = lin(ks[2], ks[3], 2, data_dim)          # layers[1]
    wl, bl = lin(ks[4], ks[5], 2, data_dim)          # layers[2] (dlogvarx)
    return {"w0": w0, "b0": b0, "wx": wx, "bx": bx, "wl": wl, "bl": bl}


def decoder_forward_ref(z, params, *, nonlinearity="relu"):
    """Pure-JAX reference for correctness checking."""
    h = _apply_nonlinearity(z @ params["w0"] + params["b0"], nonlinearity)
    x = h @ params["wx"] + params["bx"]
    logvarx = h @ params["wl"] + params["bl"]
    return x, logvarx


if __name__ == "__main__":
    batch, latent_dim, data_dim = 8, 4, 16

    key = jax.random.PRNGKey(0)
    k_z, k_p = jax.random.split(key)
    z = jax.random.normal(k_z, (batch, latent_dim), dtype=jnp.float32)
    params = init_decoder_params(k_p, latent_dim, data_dim)
    packed = pack_decoder_params(params)          # hoisted out of the hot path

    x_ref, lv_ref = decoder_forward_ref(z, params, nonlinearity="relu")

    # Module-layout wrapper (semantics of Decoder.forward).
    x, logvarx = decoder_forward(z, packed, nonlinearity="relu")
    jax.block_until_ready((x, logvarx))
    assert x.shape == (batch, data_dim) and logvarx.shape == (batch, data_dim)
    assert jnp.allclose(x, x_ref, atol=1e-5, rtol=1e-5)
    assert jnp.allclose(logvarx, lv_ref, atol=1e-5, rtol=1e-5)

    # Hot path: lane-dense outputs consumed directly (no post-kernel re-layout).
    x_t, lv_t = decoder_forward_t(z, packed, nonlinearity="relu")
    jax.block_until_ready((x_t, lv_t))
    assert x_t.shape == (data_dim, batch) and lv_t.shape == (data_dim, batch)
    assert jnp.allclose(x_t.T, x_ref, atol=1e-5, rtol=1e-5)
    assert jnp.allclose(lv_t.T, lv_ref, atol=1e-5, rtol=1e-5)

    print("KERNEL_OK")
</pallas_src>

<mosaic_0001>
module attributes {stable_mosaic.version = 11 : i64} {
  func.func @_decoder_kernel(%arg0: i32, %arg1: memref<5x2xf32, #tpu.memory_space<smem>>, %arg2: memref<4x128xf32, #tpu.memory_space<vmem>>, %arg3: memref<32x3xf32, #tpu.memory_space<vmem>>, %arg4: memref<16x128xf32, #tpu.memory_space<vmem>>, %arg5: memref<16x128xf32, #tpu.memory_space<vmem>>) attributes {dimension_semantics = [#tpu.dimension_semantics<parallel>], iteration_bounds = array<i64: 1>, scalar_prefetch = 0 : i64, scratch_operands = 0 : i64, tpu.core_type = #tpu.core_type<tc>, window_params = [{transform_indices = @transform_0, window_bounds = array<i64: 5, 2>}, {transform_indices = @transform_1, window_bounds = array<i64: 4, 128>}, {pipeline_mode = #tpu.pipeline_mode<synchronous>, transform_indices = @transform_2, window_bounds = array<i64: 32, 3>}, {transform_indices = @transform_3, window_bounds = array<i64: 16, 128>}, {transform_indices = @transform_4, window_bounds = array<i64: 16, 128>}]} {
    %c0 = arith.constant 0 : index
    %c0_0 = arith.constant 0 : index
    %0 = vector.load %arg2[%c0, %c0_0] : memref<4x128xf32, #tpu.memory_space<vmem>>, vector<4x128xf32>
    %1 = vector.extract_strided_slice %0 {offsets = [0, 0], sizes = [1, 128], strides = [1, 1]} : vector<4x128xf32> to vector<1x128xf32>
    %c0_1 = arith.constant 0 : index
    %c0_2 = arith.constant 0 : index
    %2 = memref.load %arg1[%c0_1, %c0_2] : memref<5x2xf32, #tpu.memory_space<smem>>
    %3 = vector.broadcast %2 : f32 to vector<1x128xf32>
    %4 = arith.mulf %1, %3 : vector<1x128xf32>
    %5 = vector.extract_strided_slice %0 {offsets = [1, 0], sizes = [1, 128], strides = [1, 1]} : vector<4x128xf32> to vector<1x128xf32>
    %c1 = arith.constant 1 : index
    %c0_3 = arith.constant 0 : index
    %6 = memref.load %arg1[%c1, %c0_3] : memref<5x2xf32, #tpu.memory_space<smem>>
    %7 = vector.broadcast %6 : f32 to vector<1x128xf32>
    %8 = arith.mulf %5, %7 : vector<1x128xf32>
    %9 = arith.addf %4, %8 : vector<1x128xf32>
    %10 = vector.extract_strided_slice %0 {offsets = [2, 0], sizes = [1, 128], strides = [1, 1]} : vector<4x128xf32> to vector<1x128xf32>
    %c2 = arith.constant 2 : index
    %c0_4 = arith.constant 0 : index
    %11 = memref.load %arg1[%c2, %c0_4] : memref<5x2xf32, #tpu.memory_space<smem>>
    %12 = vector.broadcast %11 : f32 to vector<1x128xf32>
    %13 = arith.mulf %10, %12 : vector<1x128xf32>
    %14 = arith.addf %9, %13 : vector<1x128xf32>
    %15 = vector.extract_strided_slice %0 {offsets = [3, 0], sizes = [1, 128], strides = [1, 1]} : vector<4x128xf32> to vector<1x128xf32>
    %c3 = arith.constant 3 : index
    %c0_5 = arith.constant 0 : index
    %16 = memref.load %arg1[%c3, %c0_5] : memref<5x2xf32, #tpu.memory_space<smem>>
    %17 = vector.broadcast %16 : f32 to vector<1x128xf32>
    %18 = arith.mulf %15, %17 : vector<1x128xf32>
    %19 = arith.addf %14, %18 : vector<1x128xf32>
    %c4 = arith.constant 4 : index
    %c0_6 = arith.constant 0 : index
    %20 = memref.load %arg1[%c4, %c0_6] : memref<5x2xf32, #tpu.memory_space<smem>>
    %21 = vector.broadcast %20 : f32 to vector<1x128xf32>
    %22 = arith.addf %19, %21 : vector<1x128xf32>
    %cst = arith.constant 0.000000e+00 : f32
    %23 = vector.broadcast %cst : f32 to vector<1x128xf32>
    %24 = arith.maximumf %22, %23 : vector<1x128xf32>
    %25 = vector.extract_strided_slice %0 {offsets = [0, 0], sizes = [1, 128], strides = [1, 1]} : vector<4x128xf32> to vector<1x128xf32>
    %c0_7 = arith.constant 0 : index
    %c1_8 = arith.constant 1 : index
    %26 = memref.load %arg1[%c0_7, %c1_8] : memref<5x2xf32, #tpu.memory_space<smem>>
    %27 = vector.broadcast %26 : f32 to vector<1x128xf32>
    %28 = arith.mulf %25, %27 : vector<1x128xf32>
    %29 = vector.extract_strided_slice %0 {offsets = [1, 0], sizes = [1, 128], strides = [1, 1]} : vector<4x128xf32> to vector<1x128xf32>
    %c1_9 = arith.constant 1 : index
    %c1_10 = arith.constant 1 : index
    %30 = memref.load %arg1[%c1_9, %c1_10] : memref<5x2xf32, #tpu.memory_space<smem>>
    %31 = vector.broadcast %30 : f32 to vector<1x128xf32>
    %32 = arith.mulf %29, %31 : vector<1x128xf32>
    %33 = arith.addf %28, %32 : vector<1x128xf32>
    %34 = vector.extract_strided_slice %0 {offsets = [2, 0], sizes = [1, 128], strides = [1, 1]} : vector<4x128xf32> to vector<1x128xf32>
    %c2_11 = arith.constant 2 : index
    %c1_12 = arith.constant 1 : index
    %35 = memref.load %arg1[%c2_11, %c1_12] : memref<5x2xf32, #tpu.memory_space<smem>>
    %36 = vector.broadcast %35 : f32 to vector<1x128xf32>
    %37 = arith.mulf %34, %36 : vector<1x128xf32>
    %38 = arith.addf %33, %37 : vector<1x128xf32>
    %39 = vector.extract_strided_slice %0 {offsets = [3, 0], sizes = [1, 128], strides = [1, 1]} : vector<4x128xf32> to vector<1x128xf32>
    %c3_13 = arith.constant 3 : index
    %c1_14 = arith.constant 1 : index
    %40 = memref.load %arg1[%c3_13, %c1_14] : memref<5x2xf32, #tpu.memory_space<smem>>
    %41 = vector.broadcast %40 : f32 to vector<1x128xf32>
    %42 = arith.mulf %39, %41 : vector<1x128xf32>
    %43 = arith.addf %38, %42 : vector<1x128xf32>
    %c4_15 = arith.constant 4 : index
    %c1_16 = arith.constant 1 : index
    %44 = memref.load %arg1[%c4_15, %c1_16] : memref<5x2xf32, #tpu.memory_space<smem>>
    %45 = vector.broadcast %44 : f32 to vector<1x128xf32>
    %46 = arith.addf %43, %45 : vector<1x128xf32>
    %cst_17 = arith.constant 0.000000e+00 : f32
    %47 = vector.broadcast %cst_17 : f32 to vector<1x128xf32>
    %48 = arith.maximumf %46, %47 : vector<1x128xf32>
    %c0_18 = arith.constant 0 : index
    %c0_19 = arith.constant 0 : index
    %49 = vector.load %arg3[%c0_18, %c0_19] : memref<32x3xf32, #tpu.memory_space<vmem>>, vector<32x1xf32>
    %c0_20 = arith.constant 0 : index
    %c1_21 = arith.constant 1 : index
    %50 = vector.load %arg3[%c0_20, %c1_21] : memref<32x3xf32, #tpu.memory_space<vmem>>, vector<32x1xf32>
    %c0_22 = arith.constant 0 : index
    %c2_23 = arith.constant 2 : index
    %51 = vector.load %arg3[%c0_22, %c2_23] : memref<32x3xf32, #tpu.memory_space<vmem>>, vector<32x1xf32>
    %52 = vector.broadcast %49 : vector<32x1xf32> to vector<32x128xf32>
    %53 = vector.broadcast %24 : vector<1x128xf32> to vector<32x128xf32>
    %54 = arith.mulf %52, %53 : vector<32x128xf32>
    %55 = vector.broadcast %51 : vector<32x1xf32> to vector<32x128xf32>
    %56 = arith.addf %55, %54 : vector<32x128xf32>
    %57 = vector.broadcast %50 : vector<32x1xf32> to vector<32x128xf32>
    %58 = vector.broadcast %48 : vector<1x128xf32> to vector<32x128xf32>
    %59 = arith.mulf %57, %58 : vector<32x128xf32>
    %60 = arith.addf %56, %59 : vector<32x128xf32>
    %61 = vector.extract_strided_slice %60 {offsets = [0, 0], sizes = [16, 128], strides = [1, 1]} : vector<32x128xf32> to vector<16x128xf32>
    %c0_24 = arith.constant 0 : index
    %c0_25 = arith.constant 0 : index
    %62 = vector.load %arg4[%c0_24, %c0_25] : memref<16x128xf32, #tpu.memory_space<vmem>>, vector<16x128xf32>
    tpu.vector_store %arg4[%c0_24, %c0_25], %61 {strides = array<i32>} : memref<16x128xf32, #tpu.memory_space<vmem>>, vector<16x128xf32>,
    %63 = vector.extract_strided_slice %60 {offsets = [16, 0], sizes = [16, 128], strides = [1, 1]} : vector<32x128xf32> to vector<16x128xf32>
    %c0_26 = arith.constant 0 : index
    %c0_27 = arith.constant 0 : index
    %64 = vector.load %arg5[%c0_26, %c0_27] : memref<16x128xf32, #tpu.memory_space<vmem>>, vector<16x128xf32>
    tpu.vector_store %arg5[%c0_26, %c0_27], %63 {strides = array<i32>} : memref<16x128xf32, #tpu.memory_space<vmem>>, vector<16x128xf32>,
    return
  }
  func.func @transform_0(%arg0: i32) -> (i32, i32) {
    %c0_i32 = arith.constant 0 : i32
    %c0_i32_0 = arith.constant 0 : i32
    %c0_i32_1 = arith.constant 0 : i32
    return %c0_i32, %c0_i32_0 : i32, i32
  }
  func.func @transform_1(%arg0: i32) -> (i32, i32) {
    %c0_i32 = arith.constant 0 : i32
    %c0_i32_0 = arith.constant 0 : i32
    return %c0_i32, %arg0 : i32, i32
  }
  func.func @transform_2(%arg0: i32) -> (i32, i32) {
    %c0_i32 = arith.constant 0 : i32
    %c0_i32_0 = arith.constant 0 : i32
    %c0_i32_1 = arith.constant 0 : i32
    return %c0_i32, %c0_i32_0 : i32, i32
  }
  func.func @transform_3(%arg0: i32) -> (i32, i32) {
    %c0_i32 = arith.constant 0 : i32
    %c0_i32_0 = arith.constant 0 : i32
    return %c0_i32, %arg0 : i32, i32
  }
  func.func @transform_4(%arg0: i32) -> (i32, i32) {
    %c0_i32 = arith.constant 0 : i32
    %c0_i32_0 = arith.constant 0 : i32
    return %c0_i32, %arg0 : i32, i32
  }
}

</mosaic_0001>

<bundles_post_ra>
// kernel: tpu_custom_call.1
= control target key start
LH: loop header
LB: loop body
LE: loop exit
PB: predicated region body
PF: predicated region fallthrough
CT: control target
= control target key end

     0   :  { %10 = vsyncpa [#allocation4], 0  ;;  %s365_s0 = inlined_call_operand.vmem [shape: f32[5,2], index: 0, kind: input, shape index: {}]   ;;  %s366_s1 = inlined_call_operand.vmem [shape: f32[4,128], index: 1, kind: input, shape index: {}]   ;;  %s367_s2 = inlined_call_operand.vmem [shape: f32[32,3], index: 2, kind: input, shape index: {}]   ;;  %s368_s3 = inlined_call_operand.hbm [shape: f32[16,128], index: 3, kind: output, shape index: {0}]   ;;  %s369_s4 = inlined_call_operand.hbm [shape: f32[16,128], index: 4, kind: output, shape index: {1}]  }
   0x1   :  { %11 = vsyncpa [#allocation3], 0 }
   0x2   :  { %12 = vsyncpa [#allocation7], 0  ;;  %s19_s17 = sshll.u32 %s365_s0, 4  ;;  %s20_s17 = int_to_ptr.vmem [resolvable:$true] %s19_s17 }
   0x3   :  { %s228_s18 = scalar_lea.vmem %s20_s17, 128  ;;  %p233_p1 = scmp.lt.s32.totalorder %s20_s17, %s20_s17 }
   0x4   :  { %p229_p0 = scmp.ne.s32.totalorder %s20_s17, %s228_s18  ;;  %p234_p2 = scmp.lt.s32.totalorder %s228_s18, %s228_s18 }
   0x6   :  { %p235_p3 = por %p234_p2, %p233_p1 }
   0x8   :  { %p236_p4 = pnand %p235_p3, %p229_p0 }
   0xa   :  { %239 = shalt.err (!%p236_p4)
}
   0xb   :  { %s290_s19 = smov [#allocation2]  }
   0xc   :  { %22 = dma.vmem_to_smem %s20_s17, 128, %s290_s19, [#allocation4]  }
   0xd   :  { %284 = dma.done.wait [#allocation4], 128  }
   0xe   :  { %285 = vsyncadd [#allocation4], 4294967168 }
   0xf   :  { %30 = sfence }
  0x10   :  { %v90_v0 = vld [vmem:[%s367_s2 + $0x10] sm:$0xff]  ;;  %v88_v1 = vld [vmem:[%s367_s2] sm:$0xff]  ;;  %v291_v2 = vmov 0   ;;  %v91_v3 = vld [vmem:[%s367_s2 + $0x18] sm:$0xff]  ;;  %v292_v5 = vmov 2   ;;  %v293_v6 = vmov 1   ;;  %v112_v36 = vlaneseq }
  0x11   :  { %223 = vset.pattern.permute.xlu1 %v291_v2  ;;  %222 = vset.pattern.permute.xlu0 %v291_v2  ;;  %v89_v4 = vld [vmem:[%s367_s2 + $0x8] sm:$0xff]  ;;  %s205_s27 = sld [smem:[#allocation2 + $0x80]]  ;;  %s210_s28 = sld [smem:[#allocation2 + $0x81]]  ;;  %v31_v7 = vld [vmem:[%s366_s1] sm:$0xf] }
  0x12   :  { %104 = vperm.xlu1 %223, %v90_v0   ;;  %94 = vperm.xlu0 %222, %v88_v1   ;;  %s32_s29 = sld [smem:[#allocation2]]  ;;  %s209_s30 = sld [smem:[#allocation2 + $0x1]]  ;;  %v113_v43 = vshrl.u32 %v112_v36, 7 }
  0x13   :  { %s206_s2 = sld [smem:[#allocation2 + $0x100]]  ;;  %s211_s5 = sld [smem:[#allocation2 + $0x101]] }
  0x14   :  { %s207_s8 = sld [smem:[#allocation2 + $0x180]]  ;;  %s212_s9 = sld [smem:[#allocation2 + $0x181]]  ;;  %v114_v46 = vsub.s32 0, %v113_v43 }
  0x15   :  { %s208_s1 = sld [smem:[#allocation2 + $0x200]]  ;;  %s213_s10 = sld [smem:[#allocation2 + $0x201]] }
  0x16   :  { %109 = vperm.xlu1 %223, %v91_v3   ;;  %99 = vperm.xlu0 %222, %v89_v4   ;;  %s294_s11 = smov [#allocation5]  }
  0x17   :  { %v36_v8 = vstv %s205_s27  ;;  %v64_v9 = vstv %s210_s28  ;;  %s177_s12 = sshll.u32 %s294_s11, 4  ;;  %s178_s12 = int_to_ptr.vmem [resolvable:$true] %s177_s12 }
  0x18   :  { %v37_v10 = vmul.f32 %v36_v8, %v31_v7  ;;  %v33_v11 = vstv %s32_s29  ;;  %v65_v13 = vmul.f32 %v64_v9, %v31_v7  ;;  %v61_v14 = vstv %s209_s30  ;;  %s240_s13 = scalar_lea.vmem %s178_s12, 256  ;;  %p245_p6 = scmp.lt.s32.totalorder %s178_s12, %s178_s12 }
  0x19   :  { %v43_v12 = vstv %s206_s2  ;;  %v71_v15 = vstv %s211_s5  ;;  %v34_v16 = vmul.f32 %v33_v11, %v31_v7  ;;  %v62_v20 = vmul.f32 %v61_v14, %v31_v7  ;;  %p241_p5 = scmp.ne.s32.totalorder %s178_s12, %s240_s13  ;;  %p246_p7 = scmp.lt.s32.totalorder %s240_s13, %s240_s13 }
  0x1a   :  { %225 = vset.pattern.permute.xlu1 %v292_v5  ;;  %224 = vset.pattern.permute.xlu0 %v292_v5  ;;  %v39_v17 = vrot.slane %v37_v10, 1  ;;  %v44_v18 = vmul.f32 %v43_v12, %v31_v7  ;;  %v50_v19 = vstv %s207_s8  ;;  %v67_v21 = vrot.slane %v65_v13, 1 }
  0x1b   :  { %125 = vperm.xlu1 %225, %v89_v4   ;;  %121 = vperm.xlu0 %224, %v88_v1   ;;  %v72_v22 = vmul.f32 %v71_v15, %v31_v7  ;;  %v78_v23 = vstv %s212_s9  ;;  %v51_v26 = vmul.f32 %v50_v19, %v31_v7  ;;  %v57_v38 = vstv %s208_s1  ;;  %p247_p8 = por %p246_p7, %p245_p6 }
  0x1c   :  { %v41_v24 = vadd.f32 %v39_v17, %v34_v16  ;;  %v46_v25 = vrot.slane %v44_v18, 2  ;;  %v69_v27 = vadd.f32 %v67_v21, %v62_v20  ;;  %v79_v29 = vmul.f32 %v78_v23, %v31_v7 }
  0x1d   :  { %v74_v28 = vrot.slane %v72_v22, 2  ;;  %v53_v31 = vrot.slane %v51_v26, 3  ;;  %v85_v42 = vstv %s213_s10  ;;  %p248_p9 = pnand %p247_p8, %p241_p5 }
  0x1e   :  { %v48_v30 = vadd.f32 %v46_v25, %v41_v24  ;;  %v81_v33 = vrot.slane %v79_v29, 3 }
  0x1f   :  { %129 = vperm.xlu1 %225, %v90_v0   ;;  %133 = vperm.xlu0 %224, %v91_v3   ;;  %v76_v32 = vadd.f32 %v74_v28, %v69_v27 }
  0x20   :  { %v55_v37 = vadd.f32 %v53_v31, %v48_v30 }
  0x21   :  { %v83_v39 = vadd.f32 %v81_v33, %v76_v32 }
  0x22   :  { %v58_v44 = vadd.f32 %v57_v38, %v55_v37 }
  0x23   :  { %226 = vset.pattern.permute.xlu1 %v293_v6  ;;  %227 = vset.pattern.permute.xlu0 %v293_v6  ;;  %v86_v45 = vadd.f32 %v85_v42, %v83_v39 }
  0x24   :  { %141 = vperm.xlu1 %226, %v88_v1   ;;  %145 = vperm.xlu0 %227, %v89_v4   ;;  %v59_v47 = vmax.f32 %v58_v44, 0.0 }
  0x25   :  { %v87_v50 = vmax.f32 %v86_v45, 0.0 }
  0x26   :  { %v115_v51 = vrot.slane %v59_v47, %v114_v46 }
  0x27   :  { %v159_v56 = vrot.slane %v87_v50, %v114_v46 }
  0x28   :  { %149 = vperm.xlu1 %226, %v90_v0  }
  0x2c   :  { %153 = vperm.xlu1 %226, %v91_v3  }
  0x91   :  { %v105_v34 = vpop.permute.xlu1 %104  ;;  %v95_v35 = vpop.permute.xlu0 %94 }
  0x92   :  { %v116_v54 = vmul.f32 %v115_v51, %v95_v35  ;;  %v118_v63 = vmul.f32 %v115_v51, %v105_v34 }
  0x95   :  { %v110_v40 = vpop.permute.xlu1 %109  ;;  %v100_v41 = vpop.permute.xlu0 %99 }
  0x96   :  { %v117_v55 = vmul.f32 %v115_v51, %v100_v41 }
  0x9a   :  { %v126_v48 = vpop.permute.xlu1 %125  ;;  %v122_v49 = vpop.permute.xlu0 %121 }
  0x9b   :  { %v137_v59 = vadd.f32 %v126_v48, %v117_v55  ;;  %v136_v60 = vadd.f32 %v122_v49, %v116_v54 }
  0x9e   :  { %v130_v52 = vpop.permute.xlu1 %129  ;;  %v134_v53 = vpop.permute.xlu0 %133 }
  0x9f   :  { %v138_v3 = vadd.f32 %v130_v52, %v118_v63 }
  0xa3   :  { %v142_v57 = vpop.permute.xlu1 %141  ;;  %v146_v58 = vpop.permute.xlu0 %145 }
  0xa4   :  { %v160_v61 = vmul.f32 %v159_v56, %v142_v57  ;;  %v161_v62 = vmul.f32 %v159_v56, %v146_v58 }
  0xa6   :  { %v164_v0 = vadd.f32 %v160_v61, %v136_v60  ;;  %v165_v1 = vadd.f32 %v161_v62, %v137_v59 }
  0xa7   :  { %v150_v2 = vpop.permute.xlu1 %149 }
  0xa8   :  { %168 = vst [vmem:[#allocation5] sm:$0xff] %v164_v0  ;;  %169 = vst [vmem:[#allocation5 + $0x8] sm:$0xff] %v165_v1  ;;  %v162_v4 = vmul.f32 %v159_v56, %v150_v2 }
  0xa9   :  { %251 = shalt.err (!%p248_p9)
}
  0xaa   :  { %s252_s16 = scalar_lea.hbm %s368_s3, 256 }
  0xab   :  { %p253_p10 = scmp.ne.s32.totalorder %s368_s3, %s252_s16  ;;  %p256_p11 = scmp.lt.u32.totalorder %s252_s16, %s368_s3 }
  0xad   :  { %p258_p12 = pnand %p256_p11, %p253_p10 }
  0xaf   :  { %261 = shalt.err (!%p258_p12)
}
  0xb0   :  { %s295_s21 = smov 128   ;;  %s296_s22 = smov 8   ;;  %v119_v5 = vmul.f32 %v115_v51, %v110_v40  ;;  %v166_v6 = vadd.f32 %v162_v4, %v138_v3  ;;  %v154_v7 = vpop.permute.xlu1 %153 }
  0xb1   :  { %183 = dma.vmem_to_hbm [thread:$0]  %s178_s12, 256, %s368_s3, [#allocation3], %s295_s21, %s295_s21, %s296_s22   ;;  %v163_v9 = vmul.f32 %v159_v56, %v154_v7 }
  0xb2   :  { %s297_s24 = smov [#allocation6]   ;;  %v139_v8 = vadd.f32 %v134_v53, %v119_v5  ;;  %170 = vst [vmem:[#allocation6] sm:$0xff] %v166_v6 }
  0xb3   :  { %s189_s25 = sshll.u32 %s297_s24, 4  ;;  %s190_s25 = int_to_ptr.vmem [resolvable:$true] %s189_s25 }
  0xb4   :  { %v167_v10 = vadd.f32 %v163_v9, %v139_v8  ;;  %s262_s26 = scalar_lea.vmem %s190_s25, 256  ;;  %p267_p0 = scmp.lt.s32.totalorder %s190_s25, %s190_s25 }
  0xb5   :  { %p263_p13 = scmp.ne.s32.totalorder %s190_s25, %s262_s26  ;;  %p268_p1 = scmp.lt.s32.totalorder %s262_s26, %s262_s26 }
  0xb6   :  { %171 = vst [vmem:[#allocation6 + $0x8] sm:$0xff] %v167_v10 }
  0xb7   :  { %p269_p2 = por %p268_p1, %p267_p0 }
  0xb9   :  { %p270_p3 = pnand %p269_p2, %p263_p13 }
  0xbb   :  { %273 = shalt.err (!%p270_p3)
}
  0xbc   :  { %s274_s28 = scalar_lea.hbm %s369_s4, 256 }
  0xbd   :  { %p275_p4 = scmp.ne.s32.totalorder %s369_s4, %s274_s28  ;;  %p278_p5 = scmp.lt.u32.totalorder %s274_s28, %s369_s4 }
  0xbf   :  { %p280_p6 = pnand %p278_p5, %p275_p4 }
  0xc1   :  { %283 = shalt.err (!%p280_p6)
}
  0xc2   :  { %195 = dma.vmem_to_hbm [thread:$0]  %s190_s25, 256, %s369_s4, [#allocation7], %s295_s21, %s295_s21, %s296_s22  }
  0xc3   :  { %286 = dma.done.wait [#allocation3], 256  }
  0xc4   :  { %287 = vsyncadd [#allocation3], 4294967040 }
  0xc5   :  { %288 = dma.done.wait [#allocation7], 256  }
  0xc6   :  { %289 = vsyncadd [#allocation7], 4294967040 }
  0xc7   :  { %202 = vsyncpa [#allocation3], 1 }
  0xc8   :  { %203 = vsyncpa [#allocation7], 1 }
  0xc9   :  { %204 = vsyncpa [#allocation4], 1 }

</bundles_post_ra>
